<compile_context>
chip_gen: v5e
topology: v5e:2x2
jax: 0.10.0
libtpu: 0.0.40
codegen_flags: <defaults>
</compile_context>

<pallas_src>
import jax
import jax.numpy as jnp
from jax.experimental import pallas as pl
from jax.experimental.pallas import tpu as pltpu

HIDDEN = 32        # logical hidden width (matches the PyTorch spec)
HIDDEN_PAD = 128   # lane-dense padded hidden width
OUT_PAD = 128      # lane-dense padded output width


def _cdiv(a, b):
    return (a + b - 1) // b


def _round_up(n, m):
    return _cdiv(n, m) * m


def qnetwork_kernel(x_ref, w1_ref, b1_ref, w2_ref, b2_ref, w3_ref, b3_ref, o_ref):
    # x: (TM, S) f32 | w*: bf16 zero-padded | b*: f32 zero-padded | o: (TM, 128) bf16
    # Cast x on the VPU (slack VALU slot) instead of a separate XLA pass over HBM.
    x = x_ref[...].astype(jnp.bfloat16)

    h1 = jnp.dot(x, w1_ref[...], preferred_element_type=jnp.float32) + b1_ref[...]
    h1 = jnp.maximum(h1, 0.0).astype(jnp.bfloat16)   # f32 ReLU (v5e-safe), bf16 MXU operand

    h2 = jnp.dot(h1, w2_ref[...], preferred_element_type=jnp.float32) + b2_ref[...]
    h2 = jnp.maximum(h2, 0.0).astype(jnp.bfloat16)

    out = jnp.dot(h2, w3_ref[...], preferred_element_type=jnp.float32) + b3_ref[...]
    o_ref[...] = out.astype(jnp.bfloat16)            # bf16 store: half the writeback bytes


def init_params(key, state_size, action_size, hidden=HIDDEN):
    """PyTorch-style uniform(-1/sqrt(fan_in), 1/sqrt(fan_in)) init.

    Weights are (in_features, out_features); biases are (1, out_features).
    These are the *logical* (unpadded, f32) parameters.
    """
    def linear(k, fan_in, fan_out):
        kw, kb = jax.random.split(k)
        bound = 1.0 / jnp.sqrt(fan_in)
        w = jax.random.uniform(kw, (fan_in, fan_out), jnp.float32, -bound, bound)
        b = jax.random.uniform(kb, (1, fan_out), jnp.float32, -bound, bound)
        return w, b

    k1, k2, k3 = jax.random.split(key, 3)
    w1, b1 = linear(k1, state_size, hidden)
    w2, b2 = linear(k2, hidden, hidden)
    w3, b3 = linear(k3, hidden, action_size)
    return {"w1": w1, "b1": b1, "w2": w2, "b2": b2, "w3": w3, "b3": b3}


def prepare_params(params):
    """One-time layout prep: zero-pad hidden/output lanes to 128 and cast the
    matmul weights to bf16.  Biases stay f32 (bias-add/ReLU run in f32)."""
    hidden = params["w1"].shape[1]
    action_size = params["w3"].shape[1]
    assert hidden <= HIDDEN_PAD, f"hidden={hidden} exceeds lane pad {HIDDEN_PAD}"
    assert action_size <= OUT_PAD, f"action_size={action_size} exceeds lane pad {OUT_PAD}"

    def pad2d(a, rows, cols):
        return jnp.pad(a, ((0, rows - a.shape[0]), (0, cols - a.shape[1])))

    s = params["w1"].shape[0]
    return {
        "w1": pad2d(params["w1"], s, HIDDEN_PAD).astype(jnp.bfloat16),
        "b1": pad2d(params["b1"], 1, HIDDEN_PAD),
        "w2": pad2d(params["w2"], HIDDEN_PAD, HIDDEN_PAD).astype(jnp.bfloat16),
        "b2": pad2d(params["b2"], 1, HIDDEN_PAD),
        "w3": pad2d(params["w3"], HIDDEN_PAD, OUT_PAD).astype(jnp.bfloat16),
        "b3": pad2d(params["b3"], 1, OUT_PAD),
    }


def _choose_tiling(B):
    """Return (tile_m, B_pad).

    * B <= 256 (acting / small eval): one tile, padded only to the 16-row
      sublane pack (bf16 output tile) — padding B=8 up to 128 rows would be
      16x wasted MXU/VPU/store work.
    * Larger B: pad only to 128 rows, then split into ~1024-row tiles while
      keeping >= 4 grid steps so the "parallel" batch axis actually shards
      across v7x's two TensorCores and each core still pipelines.
    """
    if B <= 256:
        tm = _round_up(max(B, 8), 16)
        return tm, tm
    B_pad = _round_up(B, 128)
    blocks = B_pad // 128
    n_tiles = min(blocks, max(4, _cdiv(blocks, 8)))   # target ~8*128 = 1024 rows/tile
    tile_m = _cdiv(blocks, n_tiles) * 128
    B_pad = _round_up(B_pad, tile_m)
    return tile_m, B_pad


def qnetwork_forward(x, padded_params, action_size):
    """x: (B, state_size) f32.  padded_params: output of prepare_params.
    Returns (B, action_size) f32."""
    B, S = x.shape
    tile_m, B_pad = _choose_tiling(B)
    if B_pad != B:
        x = jnp.pad(x, ((0, B_pad - B), (0, 0)))     # minimal pad (<= 127 extra rows typ.)

    w1, b1 = padded_params["w1"], padded_params["b1"]
    w2, b2 = padded_params["w2"], padded_params["b2"]
    w3, b3 = padded_params["w3"], padded_params["b3"]

    pinned = lambda shape: pl.BlockSpec(shape, lambda i: (0, 0))  # VMEM-resident params

    out = pl.pallas_call(
        qnetwork_kernel,
        out_shape=jax.ShapeDtypeStruct((B_pad, OUT_PAD), jnp.bfloat16),
        grid=(B_pad // tile_m,),
        in_specs=[
            pl.BlockSpec((tile_m, S), lambda i: (i, 0)),   # x: tiled over batch, f32
            pinned(w1.shape), pinned(b1.shape),
            pinned(w2.shape), pinned(b2.shape),
            pinned(w3.shape), pinned(b3.shape),
        ],
        out_specs=pl.BlockSpec((tile_m, OUT_PAD), lambda i: (i, 0)),
        compiler_params=pltpu.CompilerParams(
            dimension_semantics=("parallel",),   # shard batch tiles across v7x's 2 TCs
        ),
    )(x, w1, b1, w2, b2, w3, b3)

    return out[:B, :action_size].astype(jnp.float32)


def qnetwork_reference(x, params):
    """Pure-JAX reference mirroring the kernel's precision (bf16 MXU operands,
    f32 accumulation, bf16 final store) on the *unpadded* parameters — also
    validates that the lane padding is numerically inert."""
    bf16, f32 = jnp.bfloat16, jnp.float32
    h1 = jnp.maximum(
        jnp.dot(x.astype(bf16), params["w1"].astype(bf16),
                preferred_element_type=f32) + params["b1"], 0.0)
    h2 = jnp.maximum(
        jnp.dot(h1.astype(bf16), params["w2"].astype(bf16),
                preferred_element_type=f32) + params["b2"], 0.0)
    out = jnp.dot(h2.astype(bf16), params["w3"].astype(bf16),
                  preferred_element_type=f32) + params["b3"]
    return out.astype(bf16).astype(f32)


if __name__ == "__main__":
    key = jax.random.PRNGKey(0)
    k_param, k_x1, k_x2 = jax.random.split(key, 3)

    state_size = 16
    action_size = 4

    params = init_params(k_param, state_size, action_size)
    padded_params = prepare_params(params)

    # Small-batch (acting) path: single 16-row tile.
    batch = 8
    x = jax.random.normal(k_x1, (batch, state_size), jnp.float32)
    out = jax.block_until_ready(qnetwork_forward(x, padded_params, action_size))
    ref = qnetwork_reference(x, params)
    assert out.shape == (batch, action_size), out.shape
    assert jnp.allclose(out, ref, atol=1e-2, rtol=1e-2), "small-batch mismatch vs reference"

    # Multi-tile path (exercises 128-granular batch padding + >1 grid step).
    batch2 = 260
    x2 = jax.random.normal(k_x2, (batch2, state_size), jnp.float32)
    out2 = jax.block_until_ready(qnetwork_forward(x2, padded_params, action_size))
    ref2 = qnetwork_reference(x2, params)
    assert out2.shape == (batch2, action_size), out2.shape
    assert jnp.allclose(out2, ref2, atol=1e-2, rtol=1e-2), "tiled-batch mismatch vs reference"

    print("KERNEL_OK")
</pallas_src>

<mosaic_0001>
module attributes {stable_mosaic.version = 11 : i64} {
  func.func @qnetwork_kernel(%arg0: i32, %arg1: memref<16x16xf32, #tpu.memory_space<vmem>>, %arg2: memref<16x128xbf16, #tpu.memory_space<vmem>>, %arg3: memref<1x128xf32, #tpu.memory_space<vmem>>, %arg4: memref<128x128xbf16, #tpu.memory_space<vmem>>, %arg5: memref<1x128xf32, #tpu.memory_space<vmem>>, %arg6: memref<128x128xbf16, #tpu.memory_space<vmem>>, %arg7: memref<1x128xf32, #tpu.memory_space<vmem>>, %arg8: memref<16x128xbf16, #tpu.memory_space<vmem>>) attributes {dimension_semantics = [#tpu.dimension_semantics<parallel>], iteration_bounds = array<i64: 1>, scalar_prefetch = 0 : i64, scratch_operands = 0 : i64, tpu.core_type = #tpu.core_type<tc>, window_params = [{transform_indices = @transform_0, window_bounds = array<i64: 16, 16>}, {pipeline_mode = #tpu.pipeline_mode<synchronous>, transform_indices = @transform_1, window_bounds = array<i64: 16, 128>}, {pipeline_mode = #tpu.pipeline_mode<synchronous>, transform_indices = @transform_2, window_bounds = array<i64: 1, 128>}, {pipeline_mode = #tpu.pipeline_mode<synchronous>, transform_indices = @transform_3, window_bounds = array<i64: 128, 128>}, {pipeline_mode = #tpu.pipeline_mode<synchronous>, transform_indices = @transform_4, window_bounds = array<i64: 1, 128>}, {pipeline_mode = #tpu.pipeline_mode<synchronous>, transform_indices = @transform_5, window_bounds = array<i64: 128, 128>}, {pipeline_mode = #tpu.pipeline_mode<synchronous>, transform_indices = @transform_6, window_bounds = array<i64: 1, 128>}, {transform_indices = @transform_7, window_bounds = array<i64: 16, 128>}]} {
    %c0 = arith.constant 0 : index
    %c0_0 = arith.constant 0 : index
    %0 = vector.load %arg1[%c0, %c0_0] : memref<16x16xf32, #tpu.memory_space<vmem>>, vector<16x16xf32>
    %1 = arith.truncf %0 : vector<16x16xf32> to vector<16x16xbf16>
    %c0_1 = arith.constant 0 : index
    %c0_2 = arith.constant 0 : index
    %2 = vector.load %arg2[%c0_1, %c0_2] : memref<16x128xbf16, #tpu.memory_space<vmem>>, vector<16x128xbf16>
    %cst = arith.constant dense<0.000000e+00> : vector<16x128xf32>
    %3 = tpu.matmul %1, %2, %cst {dimension_numbers = #tpu.dot_dimension_numbers<[1], [0], [0], [1], [0, 0, 1, 1], [], []>} : vector<16x16xbf16>, vector<16x128xbf16>, vector<16x128xf32> -> vector<16x128xf32>
    %c0_3 = arith.constant 0 : index
    %c0_4 = arith.constant 0 : index
    %4 = vector.load %arg3[%c0_3, %c0_4] : memref<1x128xf32, #tpu.memory_space<vmem>>, vector<1x128xf32>
    %5 = vector.broadcast %4 : vector<1x128xf32> to vector<16x128xf32>
    %6 = arith.addf %3, %5 : vector<16x128xf32>
    %cst_5 = arith.constant 0.000000e+00 : f32
    %7 = vector.broadcast %cst_5 : f32 to vector<16x128xf32>
    %8 = arith.maximumf %6, %7 : vector<16x128xf32>
    %9 = arith.truncf %8 : vector<16x128xf32> to vector<16x128xbf16>
    %c0_6 = arith.constant 0 : index
    %c0_7 = arith.constant 0 : index
    %10 = vector.load %arg4[%c0_6, %c0_7] : memref<128x128xbf16, #tpu.memory_space<vmem>>, vector<128x128xbf16>
    %cst_8 = arith.constant dense<0.000000e+00> : vector<16x128xf32>
    %11 = tpu.matmul %9, %10, %cst_8 {dimension_numbers = #tpu.dot_dimension_numbers<[1], [0], [0], [1], [0, 0, 1, 1], [], []>} : vector<16x128xbf16>, vector<128x128xbf16>, vector<16x128xf32> -> vector<16x128xf32>
    %c0_9 = arith.constant 0 : index
    %c0_10 = arith.constant 0 : index
    %12 = vector.load %arg5[%c0_9, %c0_10] : memref<1x128xf32, #tpu.memory_space<vmem>>, vector<1x128xf32>
    %13 = vector.broadcast %12 : vector<1x128xf32> to vector<16x128xf32>
    %14 = arith.addf %11, %13 : vector<16x128xf32>
    %cst_11 = arith.constant 0.000000e+00 : f32
    %15 = vector.broadcast %cst_11 : f32 to vector<16x128xf32>
    %16 = arith.maximumf %14, %15 : vector<16x128xf32>
    %17 = arith.truncf %16 : vector<16x128xf32> to vector<16x128xbf16>
    %c0_12 = arith.constant 0 : index
    %c0_13 = arith.constant 0 : index
    %18 = vector.load %arg6[%c0_12, %c0_13] : memref<128x128xbf16, #tpu.memory_space<vmem>>, vector<128x128xbf16>
    %cst_14 = arith.constant dense<0.000000e+00> : vector<16x128xf32>
    %19 = tpu.matmul %17, %18, %cst_14 {dimension_numbers = #tpu.dot_dimension_numbers<[1], [0], [0], [1], [0, 0, 1, 1], [], []>} : vector<16x128xbf16>, vector<128x128xbf16>, vector<16x128xf32> -> vector<16x128xf32>
    %c0_15 = arith.constant 0 : index
    %c0_16 = arith.constant 0 : index
    %20 = vector.load %arg7[%c0_15, %c0_16] : memref<1x128xf32, #tpu.memory_space<vmem>>, vector<1x128xf32>
    %21 = vector.broadcast %20 : vector<1x128xf32> to vector<16x128xf32>
    %22 = arith.addf %19, %21 : vector<16x128xf32>
    %23 = arith.truncf %22 : vector<16x128xf32> to vector<16x128xbf16>
    %c0_17 = arith.constant 0 : index
    %c0_18 = arith.constant 0 : index
    %24 = vector.load %arg8[%c0_17, %c0_18] : memref<16x128xbf16, #tpu.memory_space<vmem>>, vector<16x128xbf16>
    tpu.vector_store %arg8[%c0_17, %c0_18], %23 {strides = array<i32>} : memref<16x128xbf16, #tpu.memory_space<vmem>>, vector<16x128xbf16>,
    return
  }
  func.func @transform_0(%arg0: i32) -> (i32, i32) {
    %c0_i32 = arith.constant 0 : i32
    %c0_i32_0 = arith.constant 0 : i32
    return %arg0, %c0_i32 : i32, i32
  }
  func.func @transform_1(%arg0: i32) -> (i32, i32) {
    %c0_i32 = arith.constant 0 : i32
    %c0_i32_0 = arith.constant 0 : i32
    %c0_i32_1 = arith.constant 0 : i32
    return %c0_i32, %c0_i32_0 : i32, i32
  }
  func.func @transform_2(%arg0: i32) -> (i32, i32) {
    %c0_i32 = arith.constant 0 : i32
    %c0_i32_0 = arith.constant 0 : i32
    %c0_i32_1 = arith.constant 0 : i32
    return %c0_i32, %c0_i32_0 : i32, i32
  }
  func.func @transform_3(%arg0: i32) -> (i32, i32) {
    %c0_i32 = arith.constant 0 : i32
    %c0_i32_0 = arith.constant 0 : i32
    %c0_i32_1 = arith.constant 0 : i32
    return %c0_i32, %c0_i32_0 : i32, i32
  }
  func.func @transform_4(%arg0: i32) -> (i32, i32) {
    %c0_i32 = arith.constant 0 : i32
    %c0_i32_0 = arith.constant 0 : i32
    %c0_i32_1 = arith.constant 0 : i32
    return %c0_i32, %c0_i32_0 : i32, i32
  }
  func.func @transform_5(%arg0: i32) -> (i32, i32) {
    %c0_i32 = arith.constant 0 : i32
    %c0_i32_0 = arith.constant 0 : i32
    %c0_i32_1 = arith.constant 0 : i32
    return %c0_i32, %c0_i32_0 : i32, i32
  }
  func.func @transform_6(%arg0: i32) -> (i32, i32) {
    %c0_i32 = arith.constant 0 : i32
    %c0_i32_0 = arith.constant 0 : i32
    %c0_i32_1 = arith.constant 0 : i32
    return %c0_i32, %c0_i32_0 : i32, i32
  }
  func.func @transform_7(%arg0: i32) -> (i32, i32) {
    %c0_i32 = arith.constant 0 : i32
    %c0_i32_0 = arith.constant 0 : i32
    return %arg0, %c0_i32 : i32, i32
  }
}

</mosaic_0001>

<bundles_post_ra>
// kernel: tpu_custom_call.1
= control target key start
LH: loop header
LB: loop body
LE: loop exit
PB: predicated region body
PF: predicated region fallthrough
CT: control target
= control target key end

     0   :  { %12 = vsyncpa [#allocation3], 0  ;;  %s635_s0 = inlined_call_operand.hbm [shape: f32[16,16], index: 0, kind: input, shape index: {}]   ;;  %s636_s1 = inlined_call_operand.hbm [shape: bf16[16,128], index: 1, kind: input, shape index: {}]   ;;  %s637_s2 = inlined_call_operand.vmem [shape: f32[1,128], index: 2, kind: input, shape index: {}]   ;;  %s638_s3 = inlined_call_operand.hbm [shape: bf16[128,128], index: 3, kind: input, shape index: {}]   ;;  %s639_s4 = inlined_call_operand.vmem [shape: f32[1,128], index: 4, kind: input, shape index: {}]   ;;  %s640_s5 = inlined_call_operand.hbm [shape: bf16[128,128], index: 5, kind: input, shape index: {}]   ;;  %s641_s6 = inlined_call_operand.vmem [shape: f32[1,128], index: 6, kind: input, shape index: {}]   ;;  %s642_s7 = inlined_call_operand.hbm [shape: bf16[16,128], index: 7, kind: output, shape index: {}]  }
   0x1   :  { %13 = vsyncpa [#allocation6], 0 }
   0x2   :  { %14 = vsyncpa [#allocation9], 0  ;;  %s33_s26 = sshll.u32 %s636_s1, 4  ;;  %s34_s26 = int_to_ptr.hbm [resolvable:$true] %s33_s26 }
   0x3   :  { %15 = vsyncpa [#allocation4], 0  ;;  %s550_s27 = smov [#allocation5]   ;;  %s20_s8 = sshll.u32 %s635_s0, 4  ;;  %s21_s8 = int_to_ptr.hbm [resolvable:$true] %s20_s8 }
   0x4   :  { %s35_s28 = sshll.u32 %s550_s27, 4  ;;  %s551_s9 = smov 64   ;;  %s36_s28 = int_to_ptr.vmem [resolvable:$true] %s35_s28 }
   0x5   :  { %s552_s10 = smov 4   ;;  %s553_s11 = smov [#allocation2]  }
   0x6   :  { %41 = dma.hbm_to_vmem [thread:$0]  %s34_s26, 128, %s36_s28, [#allocation6], %s551_s9, %s551_s9, %s552_s10  }
   0x7   :  { %s22_s12 = sshll.u32 %s553_s11, 4  ;;  %s554_s1 = smov 128   ;;  %s23_s12 = int_to_ptr.vmem [resolvable:$true] %s22_s12 }
   0x8   :  { %s555_s13 = smov 8   ;;  %s48_s16 = sshll.u32 %s638_s3, 4  ;;  %s49_s16 = int_to_ptr.hbm [resolvable:$true] %s48_s16 }
   0x9   :  { %28 = dma.hbm_to_vmem [thread:$0]  %s21_s8, 256, %s23_s12, [#allocation3], %s554_s1, %s554_s1, %s555_s13  }
   0xa   :  { %s556_s17 = smov [#allocation7]   ;;  %s63_s20 = sshll.u32 %s640_s5, 4  ;;  %s64_s20 = int_to_ptr.hbm [resolvable:$true] %s63_s20 }
   0xb   :  { %s50_s0 = sshll.u32 %s556_s17, 4  ;;  %s557_s21 = smov [#allocation8]   ;;  %s51_s0 = int_to_ptr.vmem [resolvable:$true] %s50_s0 }
   0xc   :  { %56 = dma.hbm_to_vmem [thread:$0]  %s49_s16, 1024, %s51_s0, [#allocation6], %s551_s9, %s551_s9, %s552_s10  }
   0xd   :  { %s65_s22 = sshll.u32 %s557_s21, 4  ;;  %s66_s22 = int_to_ptr.vmem [resolvable:$true] %s65_s22 }
   0xe   :  { %71 = dma.hbm_to_vmem [thread:$0]  %s64_s20, 1024, %s66_s22, [#allocation9], %s551_s9, %s551_s9, %s552_s10  }
   0xf   :  { %542 = dma.done.wait [#allocation3], 256  }
  0x10   :  { %543 = vsyncadd [#allocation3], 4294967040 }
  0x11   :  { %544 = dma.done.wait [#allocation6], 1152  }
  0x12   :  { %545 = vsyncadd [#allocation6], 4294966144 }
  0x13   :  { %546 = dma.done.wait [#allocation9], 1024  }
  0x14   :  { %547 = vsyncadd [#allocation9], 4294966272  ;;  %v388_v0 = vld [vmem:[#allocation5] sm:$0xff]  ;;  %v91_v1 = vld [vmem:[#allocation2] sm:$0xff]  ;;  %vm106_vm0 = vcmask 130048   ;;  %s558_s26 = smov [#allocation10]  }
  0x15   :  { %v92_v2 = vld [vmem:[#allocation2 + $0x8] sm:$0xff]  ;;  %v396_v4 = vld [vmem:[#allocation7 + $0x38] sm:$0xff]  ;;  %117 = vmatpush.bf16.msra.mxu0 %v388_v0  ;;  %v394_v6 = vld [vmem:[#allocation7 + $0x28] sm:$0xff]  ;;  %s302_s27 = sshll.u32 %s558_s26, 4  ;;  %s304_s30 = sshll.u32 %s642_s7, 4  ;;  %s303_s27 = int_to_ptr.vmem [resolvable:$true] %s302_s27  ;;  %s305_s30 = int_to_ptr.hbm [resolvable:$true] %s304_s30 }
  0x16   :  { %v93_v3 = vpack.c.bf16 %v92_v2, %v91_v1  ;;  %195 = vmatpush.bf16.msra.mxu1 %v396_v4  ;;  %v395_v5 = vld [vmem:[#allocation7 + $0x30] sm:$0xff]  ;;  %v393_v7 = vld [vmem:[#allocation7 + $0x20] sm:$0xff]  ;;  %v392_v8 = vld [vmem:[#allocation7 + $0x18] sm:$0xff] }
  0x17   :  { %v391_v9 = vld [vmem:[#allocation7 + $0x10] sm:$0xff]  ;;  %v390_v10 = vld [vmem:[#allocation7 + $0x8] sm:$0xff]  ;;  %v389_v11 = vld [vmem:[#allocation7] sm:$0xff] }
  0x18   :  { %323 = vmatmul.msk.bf16.vlgmr.msra.gmra.mxu0 %vm106_vm0, %v93_v3  ;;  %v404_v12 = vld [vmem:[#allocation8 + $0x38] sm:$0xff]  ;;  %v403_v13 = vld [vmem:[#allocation8 + $0x30] sm:$0xff]  ;;  %v402_v14 = vld [vmem:[#allocation8 + $0x28] sm:$0xff] }
  0x19   :  { %280 = vmatpush.bf16.msra.mxu2 %v404_v12  ;;  %v401_v15 = vld [vmem:[#allocation8 + $0x20] sm:$0xff]  ;;  %v419_v17 = vld [vmem:[%s637_s2] ss:$0 sm:$0xff]  ;;  %v400_v24 = vld [vmem:[#allocation8 + $0x18] sm:$0xff] }
  0x1a   :  { %196 = vmatpush.bf16.msra.mxu1 %v395_v5  ;;  %v399_v25 = vld [vmem:[#allocation8 + $0x10] sm:$0xff]  ;;  %v398_v26 = vld [vmem:[#allocation8 + $0x8] sm:$0xff]  ;;  %v397_v27 = vld [vmem:[#allocation8] sm:$0xff] }
  0x1b   :  { %v420_v29 = vld [vmem:[%s639_s4] ss:$0 sm:$0xff] }
  0x1c   :  { %v421_v37 = vld [vmem:[%s641_s6] ss:$0 sm:$0xff] }
  0x1d   :  { %281 = vmatpush.bf16.msra.mxu2 %v403_v13 }
  0x1e   :  { %197 = vmatpush.bf16.msra.mxu1 %v394_v6 }
  0x21   :  { %282 = vmatpush.bf16.msra.mxu2 %v402_v14 }
  0x22   :  { %198 = vmatpush.bf16.msra.mxu1 %v393_v7 }
  0x25   :  { %283 = vmatpush.bf16.msra.mxu2 %v401_v15 }
  0x26   :  { %199 = vmatpush.bf16.msra.mxu1 %v392_v8 }
  0x29   :  { %284 = vmatpush.bf16.msra.mxu2 %v400_v24 }
  0x2a   :  { %200 = vmatpush.bf16.msra.mxu1 %v391_v9 }
  0x2d   :  { %285 = vmatpush.bf16.msra.mxu2 %v399_v25 }
  0x2e   :  { %201 = vmatpush.bf16.msra.mxu1 %v390_v10 }
  0x31   :  { %286 = vmatpush.bf16.msra.mxu2 %v398_v26 }
  0x32   :  { %202 = vmatpush.bf16.msra.mxu1 %v389_v11 }
  0x35   :  { %287 = vmatpush.bf16.msra.mxu2 %v397_v27 }
  0x95   :  { %v119_v16 = vpop.f32.mrf.mxu0 }
  0x96   :  { %v120_v18 = vadd.f32 %v419_v17, %v119_v16 }
  0x98   :  { %v124_v21 = vmax.f32 %v120_v18, 0.0 }
  0x9d   :  { %v121_v19 = vpop.f32.mrf.mxu0 }
  0x9e   :  { %v122_v20 = vadd.f32 %v419_v17, %v121_v19 }
  0xa0   :  { %v125_v22 = vmax.f32 %v122_v20, 0.0 }
  0xa2   :  { %v126_v23 = vpack.c.bf16 %v125_v22, %v124_v21 }
  0xa4   :  { %203 = vmatmul.bf16.vlgmr.msra.gmra.mxu1 %v126_v23 }
 0x121   :  { %v204_v28 = vpop.f32.mrf.mxu1 }
 0x122   :  { %v205_v30 = vadd.f32 %v420_v29, %v204_v28 }
 0x124   :  { %v209_v33 = vmax.f32 %v205_v30, 0.0 }
 0x129   :  { %v206_v31 = vpop.f32.mrf.mxu1 }
 0x12a   :  { %v207_v32 = vadd.f32 %v420_v29, %v206_v31 }
 0x12c   :  { %v210_v34 = vmax.f32 %v207_v32, 0.0 }
 0x12e   :  { %v211_v35 = vpack.c.bf16 %v210_v34, %v209_v33 }
 0x130   :  { %288 = vmatmul.bf16.vlgmr.msra.gmra.mxu2 %v211_v35 }
 0x1b3   :  { %v289_v36 = vpop.f32.mrf.mxu2 }
 0x1b4   :  { %v290_v39 = vadd.f32 %v421_v37, %v289_v36 }
 0x1bb   :  { %v291_v38 = vpop.f32.mrf.mxu2 }
 0x1bc   :  { %v292_v40 = vadd.f32 %v421_v37, %v291_v38 }
 0x1be   :  { %v408_v41 = vpack.c.bf16 %v292_v40, %v290_v39 }
 0x1c0   :  { %409 = vst [vmem:[#allocation10] sm:$0xff] %v408_v41  }
 0x1c1   :  { %310 = dma.vmem_to_hbm [thread:$0]  %s303_s27, 128, %s305_s30, [#allocation4], %s551_s9, %s551_s9, %s552_s10  }
 0x1c2   :  { %548 = dma.done.wait [#allocation4], 128  }
 0x1c3   :  { %549 = vsyncadd [#allocation4], 4294967168 }
 0x1c4   :  { %315 = vsyncpa [#allocation3], 1 }
 0x1c5   :  { %316 = vsyncpa [#allocation6], 1 }
 0x1c6   :  { %317 = vsyncpa [#allocation9], 1 }
 0x1c7   :  { %318 = vsyncpa [#allocation4], 1 }

</bundles_post_ra>
